<compile_context>
chip_gen: v6e
topology: v6e:2x2x1
jax: 0.10.0
libtpu: 0.0.40
codegen_flags: <defaults>
</compile_context>

<pallas_src>
import functools

import jax
import jax.numpy as jnp
from jax.experimental import pallas as pl
from jax.experimental.pallas import tpu as pltpu


# --------------------------------------------------------------------------- #
# Kernels
# --------------------------------------------------------------------------- #
def _linear_relu_kernel_f32out(x_ref, w_ref, b_ref, o_ref):
    """One (i, j, k) grid step, accumulating directly into the f32 output tile.

    x_ref: (tm, tk) bf16   w_ref: (tk, tn) bf16   b_ref: (1, tn) f32
    o_ref: (tm, tn) f32 — resident across k (out index_map returns (i, j)).
    """
    k = pl.program_id(2)

    @pl.when(k == 0)
    def _init():
        o_ref[...] = jnp.zeros_like(o_ref)

    o_ref[...] += jnp.dot(
        x_ref[...], w_ref[...], preferred_element_type=jnp.float32
    )

    @pl.when(k == pl.num_programs(2) - 1)
    def _finalize():
        o_ref[...] = jnp.maximum(o_ref[...] + b_ref[...], 0.0)


def _linear_relu_kernel_acc(x_ref, w_ref, b_ref, o_ref, acc_ref):
    """Same computation, but with an f32 VMEM scratch accumulator for
    low-precision (e.g. bf16) output dtypes."""
    k = pl.program_id(2)

    @pl.when(k == 0)
    def _init():
        acc_ref[...] = jnp.zeros_like(acc_ref)

    acc_ref[...] += jnp.dot(
        x_ref[...], w_ref[...], preferred_element_type=jnp.float32
    )

    @pl.when(k == pl.num_programs(2) - 1)
    def _finalize():
        out = acc_ref[...] + b_ref[...]
        o_ref[...] = jnp.maximum(out, 0.0).astype(o_ref.dtype)


# --------------------------------------------------------------------------- #
# Tiling helpers
# --------------------------------------------------------------------------- #
def _choose_tile(dim, preferred, granule):
    """Pick a tile for `dim`.

    * dim <= preferred: use the full dim (full-extent blocks are exempt from
      the (8,128) divisibility rule) — no padding needed.
    * otherwise: largest granule-aligned divisor of dim that is <= preferred;
      if none exists, the granule-aligned preferred (caller zero-pads `dim`
      up to a multiple of it) — never a giant untiled fallback block.
    """
    if dim <= preferred:
        return dim
    t = (preferred // granule) * granule
    fallback = t
    while t >= granule:
        if dim % t == 0:
            return t
        t -= granule
    return fallback


def _maybe_split(dim, tile, granule):
    """If this (parallel) axis has a single block, try a granule-aligned tile
    that divides `dim` exactly and yields >= 2 blocks (keeps both v7x
    TensorCores busy). Returns the original tile if no clean split exists."""
    if dim // tile >= 2 or dim < 2 * granule:
        return tile
    t = ((dim // 2) // granule) * granule
    while t >= granule:
        if dim % t == 0:
            return t
        t -= granule
    return tile


def _pad_axis(arr, axis, multiple):
    size = arr.shape[axis]
    rem = size % multiple
    if rem == 0:
        return arr
    pad = [(0, 0)] * arr.ndim
    pad[axis] = (0, multiple - rem)
    return jnp.pad(arr, pad)


# --------------------------------------------------------------------------- #
# Wrapper
# --------------------------------------------------------------------------- #
@functools.partial(jax.jit, static_argnames=("tm", "tn", "tk"))
def my_linear_forward(x, w, b, *, tm=1024, tn=1024, tk=1024):
    """relu(x @ w + b) via a tiled Pallas TPU kernel (bf16 MXU, f32 accum)."""
    M, K = x.shape
    Kw, N = w.shape
    assert K == Kw, "input_units mismatch"
    out_dtype = x.dtype

    # bf16 MXU inputs, f32 accumulation / bias / epilogue.
    x_in = x.astype(jnp.bfloat16)
    w_in = w.astype(jnp.bfloat16)
    b_in = b.reshape(1, N).astype(jnp.float32)

    # Tile granules: 16 (bf16 sublane packing, also satisfies f32's 8) on M,
    # 128 (lane) on N and K.
    tm = _choose_tile(M, tm, 16)
    tn = _choose_tile(N, tn, 128)
    tk = _choose_tile(K, tk, 128)

    # Zero-pad only the dims whose chosen tile does not divide them exactly
    # (zero padding along K is exact; padded M/N rows/cols are sliced off).
    x_in = _pad_axis(_pad_axis(x_in, 0, tm), 1, tk)
    w_in = _pad_axis(_pad_axis(w_in, 0, tk), 1, tn)
    b_in = _pad_axis(b_in, 1, tn)
    Mp, Kp = x_in.shape
    Np = w_in.shape[1]

    # Keep >= 2 blocks on the parallel axes when cleanly possible (v7x: 2 TCs).
    if (Mp // tm) * (Np // tn) < 2:
        tn = _maybe_split(Np, tn, 128)
    if (Mp // tm) * (Np // tn) < 2:
        tm = _maybe_split(Mp, tm, 16)

    grid = (Mp // tm, Np // tn, Kp // tk)  # reduction axis (K) last / innermost

    if jnp.dtype(out_dtype) == jnp.dtype(jnp.float32):
        kernel = _linear_relu_kernel_f32out
        scratch_shapes = []           # accumulate directly into the f32 output
    else:
        kernel = _linear_relu_kernel_acc
        scratch_shapes = [pltpu.VMEM((tm, tn), jnp.float32)]

    cost = pl.CostEstimate(
        flops=2 * Mp * Np * Kp,
        bytes_accessed=2 * (Mp * Kp + Kp * Np) + 4 * Mp * Np + 4 * Np,
        transcendentals=0,
    )

    out = pl.pallas_call(
        kernel,
        out_shape=jax.ShapeDtypeStruct((Mp, Np), out_dtype),
        grid_spec=pltpu.PrefetchScalarGridSpec(
            num_scalar_prefetch=0,
            grid=grid,
            in_specs=[
                pl.BlockSpec((tm, tk), lambda i, j, k: (i, k)),   # X tile
                pl.BlockSpec((tk, tn), lambda i, j, k: (k, j)),   # W tile
                pl.BlockSpec((1, tn), lambda i, j, k: (0, j)),    # bias tile
            ],
            out_specs=pl.BlockSpec((tm, tn), lambda i, j, k: (i, j)),
            scratch_shapes=scratch_shapes,
        ),
        compiler_params=pltpu.CompilerParams(
            dimension_semantics=("parallel", "parallel", "arbitrary"),
            vmem_limit_bytes=48 * 1024 * 1024,
        ),
        cost_estimate=cost,
    )(x_in, w_in, b_in)

    if (Mp, Np) != (M, N):
        out = out[:M, :N]
    return out


# --------------------------------------------------------------------------- #
# Tests
# --------------------------------------------------------------------------- #
def _reference(x, w, b):
    """Same numerics as the kernel: bf16 inputs, f32 accumulation, f32 bias."""
    y = jnp.dot(
        x.astype(jnp.bfloat16),
        w.astype(jnp.bfloat16),
        preferred_element_type=jnp.float32,
    ) + b.astype(jnp.float32)
    return jnp.maximum(y, 0.0)


if __name__ == "__main__":
    # --- module-sized check: MyLinaer(5, 3), batch of 2 (matches the spec) ---
    input_units, out_units = 5, 3
    batch = 2

    key = jax.random.PRNGKey(0)
    k_w, k_b, k_x = jax.random.split(key, 3)

    # Deterministic stand-ins for torch.randn parameter init.
    weight = jax.random.normal(k_w, (input_units, out_units), dtype=jnp.float32)
    bias = jax.random.normal(k_b, (out_units,), dtype=jnp.float32)
    x = jax.random.normal(k_x, (batch, input_units), dtype=jnp.float32)

    out = jax.block_until_ready(my_linear_forward(x, weight, bias))
    ref = _reference(x, weight, bias)
    assert out.shape == (batch, out_units)
    assert jnp.allclose(out, ref, atol=1e-2, rtol=1e-2)

    # --- larger f32 check: exercises N tiling + both-core parallel split ---
    M2, K2, N2 = 256, 1024, 384
    kx2, kw2, kb2 = jax.random.split(jax.random.PRNGKey(1), 3)
    x2 = jax.random.normal(kx2, (M2, K2), dtype=jnp.float32)
    w2 = jax.random.normal(kw2, (K2, N2), dtype=jnp.float32)
    b2 = jax.random.normal(kb2, (N2,), dtype=jnp.float32)

    out2 = jax.block_until_ready(my_linear_forward(x2, w2, b2))
    ref2 = _reference(x2, w2, b2)
    assert out2.shape == (M2, N2)
    assert out2.dtype == jnp.float32
    assert jnp.allclose(out2, ref2, atol=1e-2, rtol=1e-2)

    # --- bf16 / unaligned-K check: exercises K zero-padding, 2-step K
    #     reduction, M-axis core split and the scratch-accumulator path ---
    M3, K3, N3 = 128, 1100, 200
    kx3, kw3, kb3 = jax.random.split(jax.random.PRNGKey(2), 3)
    x3 = jax.random.normal(kx3, (M3, K3), dtype=jnp.bfloat16)
    w3 = jax.random.normal(kw3, (K3, N3), dtype=jnp.bfloat16)
    b3 = jax.random.normal(kb3, (N3,), dtype=jnp.bfloat16)

    out3 = jax.block_until_ready(my_linear_forward(x3, w3, b3))
    ref3 = _reference(x3, w3, b3).astype(jnp.bfloat16)
    assert out3.shape == (M3, N3)
    assert out3.dtype == jnp.bfloat16
    assert jnp.allclose(
        out3.astype(jnp.float32), ref3.astype(jnp.float32), atol=5e-2, rtol=3e-2
    )

    print("KERNEL_OK")
</pallas_src>

<mosaic_0001>
module attributes {stable_mosaic.version = 11 : i64} {
  func.func @_linear_relu_kernel_f32out(%arg0: i32, %arg1: i32, %arg2: i32, %arg3: memref<2x5xbf16, #tpu.memory_space<vmem>>, %arg4: memref<5x3xbf16, #tpu.memory_space<vmem>>, %arg5: memref<1x3xf32, #tpu.memory_space<vmem>>, %arg6: memref<2x3xf32, #tpu.memory_space<vmem>>) attributes {dimension_semantics = [#tpu.dimension_semantics<parallel>, #tpu.dimension_semantics<parallel>, #tpu.dimension_semantics<arbitrary>], iteration_bounds = array<i64: 1, 1, 1>, scalar_prefetch = 0 : i64, scratch_operands = 0 : i64, tpu.core_type = #tpu.core_type<tc>, window_params = [{transform_indices = @transform_0, window_bounds = array<i64: 2, 5>}, {transform_indices = @transform_1, window_bounds = array<i64: 5, 3>}, {transform_indices = @transform_2, window_bounds = array<i64: 1, 3>}, {transform_indices = @transform_3, window_bounds = array<i64: 2, 3>}]} {
    %c0_i32 = arith.constant 0 : i32
    %0 = arith.cmpi eq, %arg2, %c0_i32 : i32
    %1 = arith.extui %0 : i1 to i32
    %c0_i32_0 = arith.constant 0 : i32
    %2 = arith.cmpi ne, %1, %c0_i32_0 : i32
    scf.if %2 {
      %cst_10 = arith.constant 0.000000e+00 : f32
      %12 = vector.broadcast %cst_10 : f32 to vector<2x3xf32>
      %c0_11 = arith.constant 0 : index
      %c0_12 = arith.constant 0 : index
      %13 = vector.load %arg6[%c0_11, %c0_12] : memref<2x3xf32, #tpu.memory_space<vmem>>, vector<2x3xf32>
      tpu.vector_store %arg6[%c0_11, %c0_12], %12 {strides = array<i32>} : memref<2x3xf32, #tpu.memory_space<vmem>>, vector<2x3xf32>,
    } else {
    }
    %c0 = arith.constant 0 : index
    %c0_1 = arith.constant 0 : index
    %3 = vector.load %arg6[%c0, %c0_1] : memref<2x3xf32, #tpu.memory_space<vmem>>, vector<2x3xf32>
    %c0_2 = arith.constant 0 : index
    %c0_3 = arith.constant 0 : index
    %4 = vector.load %arg3[%c0_2, %c0_3] : memref<2x5xbf16, #tpu.memory_space<vmem>>, vector<2x5xbf16>
    %c0_4 = arith.constant 0 : index
    %c0_5 = arith.constant 0 : index
    %5 = vector.load %arg4[%c0_4, %c0_5] : memref<5x3xbf16, #tpu.memory_space<vmem>>, vector<5x3xbf16>
    %cst = arith.constant dense<0.000000e+00> : vector<2x3xf32>
    %6 = tpu.matmul %4, %5, %cst {dimension_numbers = #tpu.dot_dimension_numbers<[1], [0], [0], [1], [0, 0, 1, 1], [], []>} : vector<2x5xbf16>, vector<5x3xbf16>, vector<2x3xf32> -> vector<2x3xf32>
    %7 = arith.addf %3, %6 : vector<2x3xf32>
    %c0_6 = arith.constant 0 : index
    %c0_7 = arith.constant 0 : index
    %8 = vector.load %arg6[%c0_6, %c0_7] : memref<2x3xf32, #tpu.memory_space<vmem>>, vector<2x3xf32>
    tpu.vector_store %arg6[%c0_6, %c0_7], %7 {strides = array<i32>} : memref<2x3xf32, #tpu.memory_space<vmem>>, vector<2x3xf32>,
    %c0_i32_8 = arith.constant 0 : i32
    %9 = arith.cmpi eq, %arg2, %c0_i32_8 : i32
    %10 = arith.extui %9 : i1 to i32
    %c0_i32_9 = arith.constant 0 : i32
    %11 = arith.cmpi ne, %10, %c0_i32_9 : i32
    scf.if %11 {
      %c0_10 = arith.constant 0 : index
      %c0_11 = arith.constant 0 : index
      %12 = vector.load %arg6[%c0_10, %c0_11] : memref<2x3xf32, #tpu.memory_space<vmem>>, vector<2x3xf32>
      %c0_12 = arith.constant 0 : index
      %c0_13 = arith.constant 0 : index
      %13 = vector.load %arg5[%c0_12, %c0_13] : memref<1x3xf32, #tpu.memory_space<vmem>>, vector<1x3xf32>
      %14 = vector.broadcast %13 : vector<1x3xf32> to vector<2x3xf32>
      %15 = arith.addf %12, %14 : vector<2x3xf32>
      %cst_14 = arith.constant 0.000000e+00 : f32
      %16 = vector.broadcast %cst_14 : f32 to vector<2x3xf32>
      %17 = arith.maximumf %15, %16 : vector<2x3xf32>
      %c0_15 = arith.constant 0 : index
      %c0_16 = arith.constant 0 : index
      %18 = vector.load %arg6[%c0_15, %c0_16] : memref<2x3xf32, #tpu.memory_space<vmem>>, vector<2x3xf32>
      tpu.vector_store %arg6[%c0_15, %c0_16], %17 {strides = array<i32>} : memref<2x3xf32, #tpu.memory_space<vmem>>, vector<2x3xf32>,
    } else {
    }
    return
  }
  func.func @transform_0(%arg0: i32, %arg1: i32, %arg2: i32) -> (i32, i32) {
    %c0_i32 = arith.constant 0 : i32
    return %arg0, %arg2 : i32, i32
  }
  func.func @transform_1(%arg0: i32, %arg1: i32, %arg2: i32) -> (i32, i32) {
    %c0_i32 = arith.constant 0 : i32
    return %arg2, %arg1 : i32, i32
  }
  func.func @transform_2(%arg0: i32, %arg1: i32, %arg2: i32) -> (i32, i32) {
    %c0_i32 = arith.constant 0 : i32
    %c0_i32_0 = arith.constant 0 : i32
    return %c0_i32, %arg1 : i32, i32
  }
  func.func @transform_3(%arg0: i32, %arg1: i32, %arg2: i32) -> (i32, i32) {
    %c0_i32 = arith.constant 0 : i32
    return %arg0, %arg1 : i32, i32
  }
}

</mosaic_0001>

<bundles_post_ra>
// kernel: my_linear_forward.1
= control target key start
LH: loop header
LB: loop body
LE: loop exit
PB: predicated region body
PF: predicated region fallthrough
CT: control target
= control target key end

     0   :  { %vm20_vm0 = vcmask 17408   ;;  %vm29_vm1 = vcmask 1041408   ;;  %vm30_vm2 = vcmask 1042432   ;;  %v143_v0 = vmov 0.0   ;;  %s182_s0 = inlined_call_operand.vmem [shape: bf16[2,5], index: 0, kind: input, shape index: {}]   ;;  %s183_s1 = inlined_call_operand.vmem [shape: bf16[5,3], index: 1, kind: input, shape index: {}]   ;;  %s184_s2 = inlined_call_operand.vmem [shape: f32[1,3], index: 2, kind: input, shape index: {}]   ;;  %s185_s3 = inlined_call_operand.hbm [shape: f32[2,3], index: 3, kind: output, shape index: {}]  }
   0x1   :  { %21 = vst.msk [vmem:[#allocation2] sm:$0x3] %vm20_vm0, %v143_v0  ;;  %111 = vmatprep.subr.bf16.mxu0 %v143_v0  ;;  %v24_v1 = vld [vmem:[%s183_s1] sm:$0x7]  ;;  %v144_v2 = vmov 65535   ;;  %vm145_vm3 = vmmov 0  }
   0x2   :  { %v31_v3 = vsel %vm29_vm1, 4294967295, %v144_v2  ;;  %113 = vmatprep.mubr.msk.bf16.mxu0 %vm145_vm3, %v143_v0 }
   0x3   :  { %8 = vsyncpa [#allocation3], 0  ;;  %v32_v4 = vsel %vm30_vm2, %v31_v3, 0  ;;  %v23_v6 = vld [vmem:[%s182_s0] sm:$0x1]  ;;  %vm25_vm4 = vcmask 39936  }
   0x4   :  { %v34_v5 = vand.u32 %v32_v4, %v24_v1  ;;  %v108_v13 = vld [vmem:[%s184_s2] ss:$0 sm:$0xff]  ;;  %s146_s17 = smov [#allocation2]  }
   0x5   :  { %s99_s18 = sshll.u32 %s146_s17, 4  ;;  %s100_s18 = int_to_ptr.vmem [resolvable:$true] %s99_s18 }
   0x6   :  { %112 = vmatpush3.bf16.msra.mxu0 %v34_v5  ;;  %s121_s0 = scalar_lea.vmem %s100_s18, 32  ;;  %p126_p1 = scmp.lt.s32.totalorder %s100_s18, %s100_s18 }
   0x7   :  { %p122_p0 = scmp.ne.s32.totalorder %s100_s18, %s121_s0  ;;  %p127_p2 = scmp.lt.s32.totalorder %s121_s0, %s121_s0 }
   0x8   :  { %v22_v7 = vld [vmem:[#allocation2] sm:$0x3] }
   0x9   :  { %114 = vmatmul.mubr.msk.bf16.vlgmr.msra.gmra.mxu0 %vm25_vm4, %v23_v6  ;;  %p128_p3 = por %p127_p2, %p126_p1 }
   0xb   :  { %p129_p4 = pnand %p128_p3, %p122_p0 }
  0xc9   :  { %v70_v8 = vpop.f32.mrf.mxu0 }
  0xca   :  { %v76_v9 = vadd.f32 %v70_v8, %v22_v7 }
  0xcb   :  { %v115_v10 = vpop.f32.mrf.mxu0 }
  0xcc   :  { %78 = vst.msk [vmem:[#allocation2] sm:$0x3] %vm20_vm0, %v76_v9 }
  0xcd   :  { %v73_v11 = vpop.f32.mrf.mxu0 }
  0xcf   :  { %v116_v12 = vpop.f32.mrf.mxu0 }
  0xd3   :  { %v82_v14 = vld [vmem:[#allocation2] sm:$0x3] }
  0xd4   :  { %v90_v15 = vadd.f32 %v108_v13, %v82_v14 }
  0xd6   :  { %v91_v16 = vmax.f32 %v90_v15, 0.0 }
  0xd8   :  { %92 = vst.msk [vmem:[#allocation2] sm:$0x3] %vm20_vm0, %v91_v16 }
  0xd9   :  { %132 = shalt.err (!%p129_p4)
}
  0xda   :  { %102 = dma.vmem_to_hbm [thread:$0]  %s100_s18, 32, %s185_s3, [#allocation3]  }
  0xdb   :  { %141 = dma.done.wait [#allocation3], 32  }
  0xdc   :  { %142 = vsyncadd [#allocation3], 4294967264 }
  0xdd   :  { %106 = vsyncpa [#allocation3], 1 }

</bundles_post_ra>
